<compile_context>
chip_gen: v6e
topology: v6e:2x2x1
jax: 0.10.0
libtpu: 0.0.40
codegen_flags: <defaults>
</compile_context>

<pallas_src>
import functools

import jax
import jax.numpy as jnp
from jax import lax
from jax.experimental import pallas as pl
from jax.experimental.pallas import tpu as pltpu

_ROW_ALIGN = 16  # multiple of both f32 (8) and bf16 (16) sublane tiles


def _pick_vmem_limit():
    # Per-generation VMEM budget: ~3/4 of reported per-core VMEM
    # (v7x: 64 MiB/TC -> ~48 MiB, v5e/v6e: 128 MiB -> ~96 MiB), floored/capped.
    try:
        cap = int(pltpu.get_tpu_info().vmem_capacity_bytes)
    except Exception:
        cap = 64 * 1024 * 1024
    return int(min(max(cap * 3 // 4, 32 * 1024 * 1024), 96 * 1024 * 1024))


_VMEM_LIMIT = _pick_vmem_limit()


# ----------------------------------------------------------------------------
# small padding / tiling helpers
# ----------------------------------------------------------------------------

def _round_up(v, m):
    return (v + m - 1) // m * m


def _pad_rows(x, m_pad):
    m = x.shape[0]
    return x if m_pad == m else jnp.pad(x, ((0, m_pad - m), (0, 0)))


def _pad_cols(x, n_pad):
    n = x.shape[-1]
    return x if n_pad == n else jnp.pad(x, ((0, 0), (0, n_pad - n)))


def _row_tiling(m, tile_m=1024, min_tiles=2):
    """Pick (padded_rows, tile): minimal padding waste, and when rows allow,
    at least `min_tiles` grid steps so both v7x TensorCores get work."""
    m_pad = _round_up(max(m, _ROW_ALIGN), _ROW_ALIGN)
    tile = min(tile_m, m_pad)
    if m_pad > _ROW_ALIGN and min_tiles > 1:
        tile = min(tile, _round_up(-(-m_pad // min_tiles), _ROW_ALIGN))
    n_tiles = -(-m_pad // tile)
    tile = _round_up(-(-m_pad // n_tiles), _ROW_ALIGN)
    return tile * n_tiles, tile


# ----------------------------------------------------------------------------
# Pallas kernels
# ----------------------------------------------------------------------------

def _gat_linear_kernel(x_ref, w_ref, o_ref):
    # One lane-dense MXU pass: o = x @ [W | W@att_src | W@att_dst | 0-pad]
    o_ref[...] = jnp.dot(x_ref[...], w_ref[...],
                         preferred_element_type=jnp.float32)


def pallas_gat_linear(x, w, att, tile_m=1024):
    """Returns (h:[M,H], a:[M,2]) with h = x@W, a[:,0]=h@att_src, a[:,1]=h@att_dst.

    The attention projection is folded into the node projection via
    W_ext = [W | W@att] zero-padded to 128 lanes; bf16 operands, f32 accumulate.
    """
    m, k = x.shape
    hdim = w.shape[1]
    na = att.shape[1]
    n_pad = _round_up(hdim + na, 128)
    w_ext = _pad_cols(jnp.concatenate([w, jnp.dot(w, att)], axis=1), n_pad)
    m_pad, tile = _row_tiling(m, tile_m)
    x_p = _pad_rows(x, m_pad).astype(jnp.bfloat16)   # MXU operand only
    w_ext = w_ext.astype(jnp.bfloat16)
    out = pl.pallas_call(
        _gat_linear_kernel,
        out_shape=jax.ShapeDtypeStruct((m_pad, n_pad), jnp.float32),
        grid=(m_pad // tile,),
        in_specs=[pl.BlockSpec((tile, k), lambda i: (i, 0)),
                  pl.BlockSpec((k, n_pad), lambda i: (0, 0))],
        out_specs=pl.BlockSpec((tile, n_pad), lambda i: (i, 0)),
        compiler_params=pltpu.CompilerParams(
            dimension_semantics=("parallel",), vmem_limit_bytes=_VMEM_LIMIT),
    )(x_p, w_ext)
    return out[:m, :hdim], out[:m, hdim:hdim + na]


def _set2set_fc_kernel(x_ref, oh_ref, wih_ref, whh_ref, b_ref,
                       fcw_ref, fcb_ref, ge_ref, h_sc, c_sc, q_sc, *, steps):
    # x_ref:  [Np, H] node embeddings (rows past num_nodes are zero-padded)
    # oh_ref: [Np, G] one-hot graph membership (f32)
    # wih: [2H, 4H], whh: [H, 4H], b: [1, 4H]  (gate order i,f,g,o along lanes)
    # fcw: [2H, H], fcb: [1, H]; output ge_ref: [G, H]
    H = whh_ref.shape[0]
    h_sc[...] = jnp.zeros_like(h_sc)
    c_sc[...] = jnp.zeros_like(c_sc)
    q_sc[...] = jnp.zeros_like(q_sc)
    x = x_ref[...]
    oh = oh_ref[...]
    contract0 = (((0,), (0,)), ((), ()))    # contract axis 0 of both (oh^T @ y)
    contract11 = (((1,), (1,)), ((), ()))   # contract last axes (y @ m^T)
    for _ in range(steps):  # trace-time unrolled: 6 fixed processing steps
        # --- fused LSTM cell: two lane-dense (4H-wide) matmuls ---
        gates = jnp.dot(q_sc[...], wih_ref[...], preferred_element_type=jnp.float32)
        gates = gates + jnp.dot(h_sc[...], whh_ref[...],
                                preferred_element_type=jnp.float32)
        gates = gates + b_ref[...]
        i_g = jax.nn.sigmoid(gates[:, 0 * H:1 * H])
        f_g = jax.nn.sigmoid(gates[:, 1 * H:2 * H])
        g_g = jnp.tanh(gates[:, 2 * H:3 * H])
        o_g = jax.nn.sigmoid(gates[:, 3 * H:4 * H])
        c_new = f_g * c_sc[...] + i_g * g_g
        h_new = o_g * jnp.tanh(c_new)
        c_sc[...] = c_new
        h_sc[...] = h_new
        # --- attention readout: per-node exp, segment ops as MXU matmuls ---
        q_node = jnp.dot(oh, h_new, preferred_element_type=jnp.float32)    # [Np,H]
        e = jnp.sum(x * q_node, axis=-1, keepdims=True)                    # [Np,1]
        e_mask = jnp.where(oh > 0.0, e, jnp.float32(-1e30))                # [Np,G]
        m = jnp.max(e_mask, axis=0, keepdims=True)                         # [1,G]
        m_node = lax.dot_general(oh, m, contract11,
                                 preferred_element_type=jnp.float32)       # [Np,1]
        ex = jnp.exp(e - m_node)                                           # [Np,1]
        s = lax.dot_general(oh, ex, contract0,
                            preferred_element_type=jnp.float32)            # [G,1]
        s_node = jnp.dot(oh, s, preferred_element_type=jnp.float32)        # [Np,1]
        # clamp keeps padded rows / empty graphs finite (alpha * x == 0 there)
        alpha = ex * pl.reciprocal(jnp.maximum(s_node, jnp.float32(1e-30)),
                                   approx=True)                            # [Np,1]
        r = lax.dot_general(oh, alpha * x, contract0,
                            preferred_element_type=jnp.float32)            # [G,H]
        q_sc[:, :H] = h_new                                                # q_star
        q_sc[:, H:] = r
    # fused fc: graph_embed = q_star @ fc_w + fc_b
    ge_ref[...] = (jnp.dot(q_sc[...], fcw_ref[...],
                           preferred_element_type=jnp.float32) + fcb_ref[...])


def pallas_set2set_fc(x, batch, n_graphs, wih, whh, b, fc_w, fc_b, steps=6):
    """Fused Set2Set(processing_steps=6) + fc Linear. Returns [n_graphs, H]."""
    num_nodes, hdim = x.shape
    n_pad = _round_up(max(num_nodes, 8), 8)
    x_p = _pad_rows(x, n_pad)
    onehot = (batch[:, None] == jnp.arange(n_graphs, dtype=batch.dtype)[None, :])
    onehot = _pad_rows(onehot.astype(jnp.float32), n_pad)        # [Np, G]
    # TODO(synk): single-TC kernel; a 2-way node split (pl.core_map + shared
    # partial max/sum combine) would feed both v7x TensorCores for huge Np.
    return pl.pallas_call(
        functools.partial(_set2set_fc_kernel, steps=steps),
        out_shape=jax.ShapeDtypeStruct((n_graphs, hdim), jnp.float32),
        in_specs=[pl.BlockSpec(memory_space=pltpu.MemorySpace.VMEM)] * 7,
        out_specs=pl.BlockSpec(memory_space=pltpu.MemorySpace.VMEM),
        scratch_shapes=[pltpu.VMEM((n_graphs, hdim), jnp.float32),       # h
                        pltpu.VMEM((n_graphs, hdim), jnp.float32),       # c
                        pltpu.VMEM((n_graphs, 2 * hdim), jnp.float32)],  # q_star
        compiler_params=pltpu.CompilerParams(vmem_limit_bytes=_VMEM_LIMIT),
    )(x_p, onehot, wih, whh, b, fc_w, fc_b.reshape(1, -1))


def _actor_head_kernel(ge_ref, og_ref, w1a_ref, w1b_ref, b1_ref,
                       w2_ref, b2_ref, o_ref):
    # Fused: cat([graph_embed, out], 1) -> Linear(5H,H) -> ReLU -> Linear(H,A_pad)
    h = jnp.dot(ge_ref[...], w1a_ref[...], preferred_element_type=jnp.float32)
    h = h + jnp.dot(og_ref[...], w1b_ref[...], preferred_element_type=jnp.float32)
    h = jnp.maximum(h + b1_ref[...], 0.0)
    o_ref[...] = jnp.dot(h, w2_ref[...], preferred_element_type=jnp.float32) + b2_ref[...]


def pallas_actor_head(ge, og, w1a, w1b, b1, w2, b2, tile_m=1024):
    t = ge.shape[0]
    hdim = w1a.shape[1]
    a = w2.shape[1]
    a_pad = _round_up(a, 128)          # lane-dense output store
    t_pad, tile = _row_tiling(t, tile_m)
    ge_p = _pad_rows(ge, t_pad)
    og_p = _pad_rows(og, t_pad)
    w2_p = _pad_cols(w2, a_pad)
    b2_p = _pad_cols(b2.reshape(1, -1), a_pad)
    out = pl.pallas_call(
        _actor_head_kernel,
        out_shape=jax.ShapeDtypeStruct((t_pad, a_pad), jnp.float32),
        grid=(t_pad // tile,),
        in_specs=[pl.BlockSpec((tile, ge.shape[1]), lambda i: (i, 0)),
                  pl.BlockSpec((tile, og.shape[1]), lambda i: (i, 0)),
                  pl.BlockSpec(w1a.shape, lambda i: (0, 0)),
                  pl.BlockSpec(w1b.shape, lambda i: (0, 0)),
                  pl.BlockSpec((1, hdim), lambda i: (0, 0)),
                  pl.BlockSpec((hdim, a_pad), lambda i: (0, 0)),
                  pl.BlockSpec((1, a_pad), lambda i: (0, 0))],
        out_specs=pl.BlockSpec((tile, a_pad), lambda i: (i, 0)),
        compiler_params=pltpu.CompilerParams(
            dimension_semantics=("parallel",), vmem_limit_bytes=_VMEM_LIMIT),
    )(ge_p, og_p, w1a, w1b, b1.reshape(1, -1), w2_p, b2_p)
    return out[:t, :a]


# ----------------------------------------------------------------------------
# Graph glue (plain JAX): edge segment softmax, GAT aggregation, pad_sequence
# ----------------------------------------------------------------------------

def segment_softmax(e, seg, num_segments):
    m = jax.ops.segment_max(e, seg, num_segments=num_segments)
    ex = jnp.exp(e - m[seg])
    s = jax.ops.segment_sum(ex, seg, num_segments=num_segments)
    return ex / s[seg]


def gat_forward(p, x, edge_src, edge_dst):
    num_nodes = x.shape[0]
    h, att = pallas_gat_linear(x, p["gat_w"], p["gat_att"])      # [M,H], [M,2]
    loops = jnp.arange(num_nodes, dtype=edge_src.dtype)
    src = jnp.concatenate([edge_src, loops])
    dst = jnp.concatenate([edge_dst, loops])
    e = jax.nn.leaky_relu(att[src, 0] + att[dst, 1], negative_slope=0.2)
    alpha = segment_softmax(e, dst, num_nodes)
    out = jax.ops.segment_sum(alpha[:, None] * h[src], dst, num_segments=num_nodes)
    return out + p["gat_bias"]


def rtgn_gat_actor_forward(params, hidden_dim, x, edge_src, edge_dst, batch,
                           num_graphs, nonring, nrbidx, torsion_list_sizes):
    out = gat_forward(params, x, edge_src, edge_dst)             # [num_nodes, H]
    graph_embed = pallas_set2set_fc(out, batch, num_graphs,
                                    params["lstm_wih"], params["lstm_whh"],
                                    params["lstm_b"],
                                    params["fc_w"], params["fc_b"])  # [N, H]

    # TODO(synk): these two gathers stay as XLA ops; fusing them into the actor
    # head via scalar-prefetch + pl.Element row-gather would force a 1-row-per-
    # grid-step kernel, which loses for large torsion counts.
    ge = graph_embed[nrbidx]                                     # index_select dim=0
    og = out[nonring.reshape(-1)].reshape(-1, 4 * hidden_dim)    # [T, 4H]

    logits_flat = pallas_actor_head(ge, og,
                                    params["mlp_w1a"], params["mlp_w1b"],
                                    params["mlp_b1"],
                                    params["mlp_w2"], params["mlp_b2"])  # [T, A]

    # split(torsion_list_sizes) + pad_sequence (zero pad) + permute(1,0,2)
    sizes = jnp.asarray(torsion_list_sizes, dtype=jnp.int32)
    max_t = int(max(torsion_list_sizes))
    offsets = jnp.cumsum(sizes) - sizes
    pos = jnp.arange(logits_flat.shape[0], dtype=jnp.int32) - offsets[nrbidx]
    padded = jnp.zeros((num_graphs, max_t, logits_flat.shape[1]), logits_flat.dtype)
    padded = padded.at[nrbidx, pos].set(logits_flat)
    return padded                                                # [N, max_T, A]


# ----------------------------------------------------------------------------
# Deterministic parameter init (shapes implied by the module's __init__)
# ----------------------------------------------------------------------------

def init_params(key, node_dim, hidden_dim, action_dim):
    H = hidden_dim
    ks = jax.random.split(key, 16)

    def rnd(k, shape, scale=0.1):
        return scale * jax.random.normal(k, shape, dtype=jnp.float32)

    p = {}
    # GAT (single GATConv node_dim -> H, heads=1)
    p["gat_w"] = rnd(ks[0], (node_dim, H))
    att_src = rnd(ks[1], (H,))
    att_dst = rnd(ks[2], (H,))
    p["gat_att"] = jnp.stack([att_src, att_dst], axis=1)          # [H, 2]
    p["gat_bias"] = rnd(ks[3], (H,))
    # Set2Set LSTM: input 2H, hidden H (PyTorch gate order i,f,g,o),
    # re-laid for lane-dense fused gates: wih:[2H,4H], whh:[H,4H], b:[1,4H]
    wih = rnd(ks[4], (4 * H, 2 * H))
    whh = rnd(ks[5], (4 * H, H))
    b_ih = rnd(ks[6], (4 * H,))
    b_hh = rnd(ks[7], (4 * H,))
    p["lstm_wih"] = wih.T                                         # [2H, 4H]
    p["lstm_whh"] = whh.T                                         # [H, 4H]
    p["lstm_b"] = (b_ih + b_hh).reshape(1, 4 * H)                 # [1, 4H]
    # fc: Linear(2H, H)
    p["fc_w"] = rnd(ks[8], (2 * H, H))
    p["fc_b"] = rnd(ks[9], (H,))
    # mlp: Linear(5H, H) -> ReLU -> Linear(H, A)
    # reference cats [graph_embed, out]: rows [:H] multiply graph_embed,
    # rows [H:] multiply the 4H torsion-node part.
    w1 = rnd(ks[10], (5 * H, H))
    p["mlp_w1a"] = w1[:H]
    p["mlp_w1b"] = w1[H:]
    p["mlp_b1"] = rnd(ks[11], (H,))
    p["mlp_w2"] = rnd(ks[12], (H, action_dim))
    p["mlp_b2"] = rnd(ks[13], (action_dim,))
    return p


# ----------------------------------------------------------------------------
# Example
# ----------------------------------------------------------------------------

if __name__ == "__main__":
    key = jax.random.PRNGKey(0)
    k_param, k_x = jax.random.split(key)

    hidden_dim, node_dim, action_dim = 32, 8, 6

    # Graph batch: 3 graphs with 5, 6, 4 nodes (chain edges, bidirectional)
    nodes_per_graph = [5, 6, 4]
    num_graphs = len(nodes_per_graph)
    num_nodes = sum(nodes_per_graph)
    batch = jnp.array(sum([[g] * n for g, n in enumerate(nodes_per_graph)], []),
                      dtype=jnp.int32)

    edges = []
    off = 0
    for n in nodes_per_graph:
        for i in range(n - 1):
            edges.append((off + i, off + i + 1))
            edges.append((off + i + 1, off + i))
        off += n
    edges = jnp.array(edges, dtype=jnp.int32)
    edge_src, edge_dst = edges[:, 0], edges[:, 1]

    x = jax.random.normal(k_x, (num_nodes, node_dim), dtype=jnp.float32)

    # Torsions: 4 consecutive atoms each; sizes per graph = [2, 3, 1]
    torsion_list_sizes = [2, 3, 1]
    nonring = jnp.array([[0, 1, 2, 3], [1, 2, 3, 4],
                         [5, 6, 7, 8], [6, 7, 8, 9], [7, 8, 9, 10],
                         [11, 12, 13, 14]], dtype=jnp.int32)
    nrbidx = jnp.array([0, 0, 1, 1, 1, 2], dtype=jnp.int32)

    params = init_params(k_param, node_dim, hidden_dim, action_dim)

    logit = rtgn_gat_actor_forward(params, hidden_dim, x, edge_src, edge_dst,
                                   batch, num_graphs, nonring, nrbidx,
                                   torsion_list_sizes)
    logit = jax.block_until_ready(logit)
    assert logit.shape == (num_graphs, max(torsion_list_sizes), action_dim)
    print("KERNEL_OK")
</pallas_src>

<mosaic_0001>
module attributes {stable_mosaic.version = 11 : i64} {
  func.func @_gat_linear_kernel(%arg0: i32, %arg1: memref<16x8xbf16, #tpu.memory_space<vmem>>, %arg2: memref<8x128xbf16, #tpu.memory_space<vmem>>, %arg3: memref<16x128xf32, #tpu.memory_space<vmem>>) attributes {dimension_semantics = [#tpu.dimension_semantics<parallel>], iteration_bounds = array<i64: 1>, scalar_prefetch = 0 : i64, scratch_operands = 0 : i64, tpu.core_type = #tpu.core_type<tc>, window_params = [{transform_indices = @transform_0, window_bounds = array<i64: 16, 8>}, {pipeline_mode = #tpu.pipeline_mode<synchronous>, transform_indices = @transform_1, window_bounds = array<i64: 8, 128>}, {transform_indices = @transform_2, window_bounds = array<i64: 16, 128>}]} {
    %c0 = arith.constant 0 : index
    %c0_0 = arith.constant 0 : index
    %0 = vector.load %arg1[%c0, %c0_0] : memref<16x8xbf16, #tpu.memory_space<vmem>>, vector<16x8xbf16>
    %c0_1 = arith.constant 0 : index
    %c0_2 = arith.constant 0 : index
    %1 = vector.load %arg2[%c0_1, %c0_2] : memref<8x128xbf16, #tpu.memory_space<vmem>>, vector<8x128xbf16>
    %cst = arith.constant dense<0.000000e+00> : vector<16x128xf32>
    %2 = tpu.matmul %0, %1, %cst {dimension_numbers = #tpu.dot_dimension_numbers<[1], [0], [0], [1], [0, 0, 1, 1], [], []>} : vector<16x8xbf16>, vector<8x128xbf16>, vector<16x128xf32> -> vector<16x128xf32>
    %c0_3 = arith.constant 0 : index
    %c0_4 = arith.constant 0 : index
    %3 = vector.load %arg3[%c0_3, %c0_4] : memref<16x128xf32, #tpu.memory_space<vmem>>, vector<16x128xf32>
    tpu.vector_store %arg3[%c0_3, %c0_4], %2 {strides = array<i32>} : memref<16x128xf32, #tpu.memory_space<vmem>>, vector<16x128xf32>,
    return
  }
  func.func @transform_0(%arg0: i32) -> (i32, i32) {
    %c0_i32 = arith.constant 0 : i32
    %c0_i32_0 = arith.constant 0 : i32
    return %arg0, %c0_i32 : i32, i32
  }
  func.func @transform_1(%arg0: i32) -> (i32, i32) {
    %c0_i32 = arith.constant 0 : i32
    %c0_i32_0 = arith.constant 0 : i32
    %c0_i32_1 = arith.constant 0 : i32
    return %c0_i32, %c0_i32_0 : i32, i32
  }
  func.func @transform_2(%arg0: i32) -> (i32, i32) {
    %c0_i32 = arith.constant 0 : i32
    %c0_i32_0 = arith.constant 0 : i32
    return %arg0, %c0_i32 : i32, i32
  }
}

</mosaic_0001>

<bundles_post_ra>
// kernel: tpu_custom_call.1
= control target key start
LH: loop header
LB: loop body
LE: loop exit
PB: predicated region body
PF: predicated region fallthrough
CT: control target
= control target key end

     0   :  { %vm25_vm0 = vcmask 1043456   ;;  %v126_v1 = vmov 0.0   ;;  %vm127_vm1 = vmmov 0   ;;  %vm21_vm2 = vcmask 64512   ;;  %s155_s0 = inlined_call_operand.vmem [shape: bf16[16,8], index: 0, kind: input, shape index: {}]   ;;  %s156_s1 = inlined_call_operand.vmem [shape: bf16[8,128], index: 1, kind: input, shape index: {}]   ;;  %s157_s2 = inlined_call_operand.hbm [shape: f32[16,128], index: 2, kind: output, shape index: {}]  }
   0x1   :  { %v15_v0 = vld [vmem:[%s156_s1] sm:$0xf]  ;;  %92 = vmatprep.subr.bf16.mxu0 %v126_v1  ;;  %94 = vmatprep.mubr.msk.bf16.mxu0 %vm127_vm1, %v126_v1 }
   0x2   :  { %v27_v2 = vsel %vm25_vm0, %v15_v0, 0  ;;  %v103_v3 = vld [vmem:[%s155_s0] sm:$0xff]  }
   0x3   :  { %93 = vmatpush3.bf16.msra.mxu0 %v27_v2 }
   0x4   :  { %7 = vsyncpa [#allocation3], 0  ;;  %s128_s13 = smov [#allocation2]  }
   0x5   :  { %s77_s14 = sshll.u32 %s128_s13, 4  ;;  %s78_s14 = int_to_ptr.vmem [resolvable:$true] %s77_s14 }
   0x6   :  { %95 = vmatmul.mubr.msk.bf16.vlgmr.msra.gmra.mxu0 %vm21_vm2, %v103_v3  ;;  %s104_s1 = scalar_lea.vmem %s78_s14, 256  ;;  %p109_p1 = scmp.lt.s32.totalorder %s78_s14, %s78_s14 }
   0x7   :  { %p105_p0 = scmp.ne.s32.totalorder %s78_s14, %s104_s1  ;;  %p110_p2 = scmp.lt.s32.totalorder %s104_s1, %s104_s1 }
   0x9   :  { %p111_p3 = por %p110_p2, %p109_p1 }
   0xb   :  { %p112_p4 = pnand %p111_p3, %p105_p0 }
  0xc6   :  { %v63_v4 = vpop.f32.mrf.mxu0 }
  0xc7   :  { %70 = vst [vmem:[#allocation2] sm:$0xff] %v63_v4 }
  0xc8   :  { %v96_v5 = vpop.f32.mrf.mxu0 }
  0xca   :  { %v66_v6 = vpop.f32.mrf.mxu0 }
  0xcb   :  { %71 = vst [vmem:[#allocation2 + $0x8] sm:$0xff] %v66_v6 }
  0xcc   :  { %v97_v7 = vpop.f32.mrf.mxu0 }
  0xcd   :  { %115 = shalt.err (!%p112_p4)
}
  0xce   :  { %s129_s0 = smov 128   ;;  %s130_s15 = smov 8  }
  0xcf   :  { %83 = dma.vmem_to_hbm [thread:$0]  %s78_s14, 256, %s157_s2, [#allocation3], %s129_s0, %s129_s0, %s130_s15  }
  0xd0   :  { %124 = dma.done.wait [#allocation3], 256  }
  0xd1   :  { %125 = vsyncadd [#allocation3], 4294967040 }
  0xd2   :  { %87 = vsyncpa [#allocation3], 1 }

</bundles_post_ra>
